<compile_context>
chip_gen: v7x
topology: tpu7x:2x2x1
jax: 0.10.0
libtpu: 0.0.40
codegen_flags: <defaults>
</compile_context>

<pallas_src>
import functools
import math

import jax
import jax.numpy as jnp
from jax.experimental import pallas as pl
from jax.experimental.pallas import tpu as pltpu


def _round_up(x, m):
    return (x + m - 1) // m * m


def _pad2(a, rows, cols):
    return jnp.pad(a, ((0, rows - a.shape[0]), (0, cols - a.shape[1])))


def _choose_tiles(n):
    """Return (n_pad, tm, tk). tm is None -> fully-fused small-graph path."""
    if n <= 512:
        return _round_up(n, 128), None, None
    n_pad = _round_up(n, 512)
    tk = 1024 if n_pad % 1024 == 0 else 512
    return n_pad, 512, tk


def _vmem_limit(est_bytes):
    # Explicit scoped-VMEM budget; stays below v7x's 64 MiB physical VMEM.
    return int(min(max(1.25 * est_bytes, 16 << 20), 48 << 20))


# ----------------------------- Pallas kernels ------------------------------

def _linear_kernel(x_ref, w_ref, b_ref, o_ref, *, relu):
    y = jnp.dot(x_ref[...], w_ref[...], preferred_element_type=jnp.float32)
    y = y + b_ref[...]
    if relu:
        y = jnp.maximum(y, 0.0)
    o_ref[...] = y.astype(o_ref.dtype)


def linear(x, w, b, *, relu, out_dtype, tm):
    """y = x @ w + b (optional ReLU), row-tiled."""
    n_pad, f = x.shape
    h = w.shape[1]
    return pl.pallas_call(
        functools.partial(_linear_kernel, relu=relu),
        out_shape=jax.ShapeDtypeStruct((n_pad, h), out_dtype),
        grid=(n_pad // tm,),
        in_specs=[
            pl.BlockSpec((tm, f), lambda i: (i, 0)),   # node-row tile of x
            pl.BlockSpec((f, h), lambda i: (0, 0)),    # full weight (constant)
            pl.BlockSpec((1, h), lambda i: (0, 0)),    # bias
        ],
        out_specs=pl.BlockSpec((tm, h), lambda i: (i, 0)),
        compiler_params=pltpu.CompilerParams(dimension_semantics=("parallel",)),
    )(x, w, b)


def _gcn_layer_kernel(g_ref, x_ref, h0_ref, wab_ref, *rest,
                      fuse_fc, tk, resident_rhs):
    if fuse_fc:
        wfc_ref, bfc_ref, o_ref, acc_ref = rest
    else:
        o_ref, acc_ref = rest

    k = pl.program_id(1)

    @pl.when(k == 0)
    def _():
        acc_ref[...] = jnp.zeros_like(acc_ref)

    # hi = G @ h   (bf16 operands, f32 accumulation, K-tiled; rhs is resident)
    if resident_rhs:
        start = pl.multiple_of(k * tk, tk)
        rhs = x_ref[pl.ds(start, tk), :]
    else:
        rhs = x_ref[...]
    acc_ref[...] += jnp.dot(g_ref[...], rhs, preferred_element_type=jnp.float32)

    @pl.when(k == pl.num_programs(1) - 1)
    def _():
        # Folded residual/identity algebra, single K=2*h_pad bf16 MXU dot:
        #   out = relu(concat([hi, h0], -1) @ Wab)
        hi_bf = acc_ref[...].astype(jnp.bfloat16)
        support = jnp.concatenate([hi_bf, h0_ref[...]], axis=-1)
        h_new = jnp.maximum(
            jnp.dot(support, wab_ref[...], preferred_element_type=jnp.float32),
            0.0)
        if fuse_fc:   # final Linear fused into the last layer's epilogue
            y = jnp.dot(h_new.astype(jnp.bfloat16), wfc_ref[...],
                        preferred_element_type=jnp.float32) + bfc_ref[...]
            o_ref[...] = y.astype(o_ref.dtype)
        else:
            o_ref[...] = h_new.astype(o_ref.dtype)


def gcn_layer(g_bf, x_bf, h0_bf, wab, w_fc=None, b_fc=None, *,
              n_pad, tm, tk, h_pad, resident_rhs):
    fuse_fc = w_fc is not None
    c_out = w_fc.shape[1] if fuse_fc else h_pad
    out_dtype = jnp.float32 if fuse_fc else jnp.bfloat16  # bf16: next spmm rhs
    out_bytes = 4 if fuse_fc else 2

    if resident_rhs:
        # Fetched once per layer (constant block index), sliced by K in-kernel.
        rhs_spec = pl.BlockSpec((n_pad, h_pad), lambda i, k: (0, 0))
    else:
        rhs_spec = pl.BlockSpec((tk, h_pad), lambda i, k: (k, 0))

    in_specs = [
        pl.BlockSpec((tm, tk), lambda i, k: (i, k)),            # G tile (bf16)
        rhs_spec,                                               # spmm rhs (bf16)
        pl.BlockSpec((tm, h_pad), lambda i, k: (i, 0)),         # h0 tile (bf16)
        pl.BlockSpec((2 * h_pad, h_pad), lambda i, k: (0, 0)),  # folded Wab
    ]
    args = [g_bf, x_bf, h0_bf, wab]
    if fuse_fc:
        in_specs += [pl.BlockSpec((h_pad, c_out), lambda i, k: (0, 0)),
                     pl.BlockSpec((1, c_out), lambda i, k: (0, 0))]
        args += [w_fc, b_fc]

    est = (2 * tm * tk * 2
           + (2 * n_pad * h_pad * 2 if resident_rhs else 2 * tk * h_pad * 2)
           + 2 * tm * h_pad * 2
           + 2 * 2 * h_pad * h_pad * 2
           + (2 * h_pad * c_out * 2 + 2 * c_out * 4 if fuse_fc else 0)
           + tm * h_pad * 4
           + 2 * tm * c_out * out_bytes)

    return pl.pallas_call(
        functools.partial(_gcn_layer_kernel, fuse_fc=fuse_fc, tk=tk,
                          resident_rhs=resident_rhs),
        out_shape=jax.ShapeDtypeStruct((n_pad, c_out), out_dtype),
        grid=(n_pad // tm, n_pad // tk),
        in_specs=in_specs,
        out_specs=pl.BlockSpec((tm, c_out), lambda i, k: (i, 0)),
        scratch_shapes=[pltpu.VMEM((tm, h_pad), jnp.float32)],
        compiler_params=pltpu.CompilerParams(
            dimension_semantics=("parallel", "arbitrary"),
            vmem_limit_bytes=_vmem_limit(est)),
    )(*args)


def _fused_small_kernel(x_ref, w0_ref, b0_ref, g_ref, wab_ref, w1_ref, b1_ref,
                        o_ref, h_ref, h0_ref):
    """Whole network for small graphs. Grid = (nlayers,); G/h/h0 live in VMEM."""
    l = pl.program_id(0)

    @pl.when(l == 0)
    def _():
        h0 = jnp.maximum(
            jnp.dot(x_ref[...], w0_ref[...], preferred_element_type=jnp.float32)
            + b0_ref[...], 0.0).astype(jnp.bfloat16)
        h0_ref[...] = h0
        h_ref[...] = h0

    hi = jnp.dot(g_ref[...], h_ref[...], preferred_element_type=jnp.float32)
    support = jnp.concatenate([hi.astype(jnp.bfloat16), h0_ref[...]], axis=-1)
    h_new = jnp.maximum(
        jnp.dot(support, wab_ref[...], preferred_element_type=jnp.float32), 0.0)
    h_ref[...] = h_new.astype(jnp.bfloat16)

    @pl.when(l == pl.num_programs(0) - 1)
    def _():
        y = jnp.dot(h_new.astype(jnp.bfloat16), w1_ref[...],
                    preferred_element_type=jnp.float32) + b1_ref[...]
        o_ref[...] = y.astype(o_ref.dtype)


def gcnii_fused_small(x_bf, w0_bf, b0, g_bf, wab_stack, w1_bf, b1, *,
                      n_pad, f_pad, h_pad, c_pad):
    nlayers = wab_stack.shape[0]
    est = (2 * (n_pad * f_pad * 2 + f_pad * h_pad * 2 + h_pad * 4
                + n_pad * n_pad * 2 + 2 * h_pad * h_pad * 2
                + h_pad * c_pad * 2 + c_pad * 4 + n_pad * c_pad * 4)
           + 2 * n_pad * h_pad * 2)
    return pl.pallas_call(
        _fused_small_kernel,
        out_shape=jax.ShapeDtypeStruct((n_pad, c_pad), jnp.float32),
        grid=(nlayers,),
        in_specs=[
            pl.BlockSpec((n_pad, f_pad), lambda l: (0, 0)),          # x (bf16)
            pl.BlockSpec((f_pad, h_pad), lambda l: (0, 0)),          # fc0 W (bf16)
            pl.BlockSpec((1, h_pad), lambda l: (0, 0)),              # fc0 b (f32)
            pl.BlockSpec((n_pad, n_pad), lambda l: (0, 0)),          # G (bf16)
            pl.BlockSpec((None, 2 * h_pad, h_pad), lambda l: (l, 0, 0)),  # Wab[l]
            pl.BlockSpec((h_pad, c_pad), lambda l: (0, 0)),          # fc1 W (bf16)
            pl.BlockSpec((1, c_pad), lambda l: (0, 0)),              # fc1 b (f32)
        ],
        out_specs=pl.BlockSpec((n_pad, c_pad), lambda l: (0, 0)),
        scratch_shapes=[pltpu.VMEM((n_pad, h_pad), jnp.bfloat16),    # h (layer io)
                        pltpu.VMEM((n_pad, h_pad), jnp.bfloat16)],   # h0
        compiler_params=pltpu.CompilerParams(
            dimension_semantics=("arbitrary",),
            vmem_limit_bytes=_vmem_limit(est)),
    )(x_bf, w0_bf, b0, g_bf, wab_stack, w1_bf, b1)


# ------------------------------ model wrapper -------------------------------

def init_params(key, nfeat, nlayers, nhidden, nclass, variant):
    keys = jax.random.split(key, nlayers + 4)
    b0 = 1.0 / math.sqrt(nfeat)
    w_fc0 = jax.random.uniform(keys[0], (nfeat, nhidden), jnp.float32, -b0, b0)
    b_fc0 = jax.random.uniform(keys[1], (1, nhidden), jnp.float32, -b0, b0)
    b1 = 1.0 / math.sqrt(nhidden)
    w_fc1 = jax.random.uniform(keys[2], (nhidden, nclass), jnp.float32, -b1, b1)
    b_fc1 = jax.random.uniform(keys[3], (1, nclass), jnp.float32, -b1, b1)
    in_f = 2 * nhidden if variant else nhidden
    stdv = 1.0 / math.sqrt(nhidden)
    conv_ws = [
        jax.random.uniform(keys[4 + i], (in_f, nhidden), jnp.float32, -stdv, stdv)
        for i in range(nlayers)
    ]
    return dict(w_fc0=w_fc0, b_fc0=b_fc0, w_fc1=w_fc1, b_fc1=b_fc1,
                conv_ws=conv_ws)


def _fold_conv_weight(w, theta, alpha, nhidden, h_pad, variant):
    """theta*(support @ W) + (1-theta)*r  ==  concat([hi, h0], -1) @ Wab (exact).

    Returns padded bf16 Wab = [Wa; Wb], shape (2*h_pad, h_pad)."""
    eye = jnp.eye(nhidden, dtype=jnp.float32)
    if variant:
        wa = theta * w[:nhidden, :] + (1.0 - theta) * (1.0 - alpha) * eye
        wb = theta * w[nhidden:, :] + (1.0 - theta) * alpha * eye
    else:
        wf = theta * w + (1.0 - theta) * eye
        wa = (1.0 - alpha) * wf
        wb = alpha * wf
    wab = jnp.concatenate([_pad2(wa, h_pad, h_pad), _pad2(wb, h_pad, h_pad)],
                          axis=0)
    return wab.astype(jnp.bfloat16)


def gcnii_forward(params, x, adj, g, *, lamda, alpha, variant):
    del adj  # stored but unused by the PyTorch forward's math; kept for parity
    n, nfeat = x.shape
    nhidden = params["w_fc0"].shape[1]
    nclass = params["w_fc1"].shape[1]
    nlayers = len(params["conv_ws"])
    assert nlayers >= 1  # the reference module also requires >=1 conv layer

    n_pad, tm, tk = _choose_tiles(n)
    f_pad = _round_up(nfeat, 128)
    h_pad = _round_up(nhidden, 128)
    c_pad = _round_up(nclass, 128)

    # One-time padding / dtype prep (lane-dense; bf16 operands for MXU matmuls).
    x_bf = _pad2(x, n_pad, f_pad).astype(jnp.bfloat16)
    g_bf = _pad2(g, n_pad, n_pad).astype(jnp.bfloat16)
    w0_bf = _pad2(params["w_fc0"], f_pad, h_pad).astype(jnp.bfloat16)
    b0 = _pad2(params["b_fc0"], 1, h_pad)
    w1_bf = _pad2(params["w_fc1"], h_pad, c_pad).astype(jnp.bfloat16)
    b1 = _pad2(params["b_fc1"], 1, c_pad)

    wabs = [
        _fold_conv_weight(w, math.log(lamda / (i + 1) + 1.0), alpha,
                          nhidden, h_pad, variant)
        for i, w in enumerate(params["conv_ws"])
    ]

    # TODO(synk): F.dropout with training=True is stochastic; inference identity used.

    if tm is None:
        # Small graph: everything fused in one pallas_call; grid iterates layers.
        wab_stack = jnp.stack(wabs, axis=0)
        out = gcnii_fused_small(x_bf, w0_bf, b0, g_bf, wab_stack, w1_bf, b1,
                                n_pad=n_pad, f_pad=f_pad, h_pad=h_pad,
                                c_pad=c_pad)
        return out[:n, :nclass]

    # Large graph: tiled per-layer kernels; rhs resident unless it would blow VMEM.
    resident_rhs = (2 * n_pad * h_pad * 2) <= (12 << 20)

    h0_bf = linear(x_bf, w0_bf, b0, relu=True, out_dtype=jnp.bfloat16, tm=tm)
    h = h0_bf
    out = None
    for i, wab in enumerate(wabs):
        if i == nlayers - 1:
            out = gcn_layer(g_bf, h, h0_bf, wab, w_fc=w1_bf, b_fc=b1,
                            n_pad=n_pad, tm=tm, tk=tk, h_pad=h_pad,
                            resident_rhs=resident_rhs)
        else:
            h = gcn_layer(g_bf, h, h0_bf, wab, n_pad=n_pad, tm=tm, tk=tk,
                          h_pad=h_pad, resident_rhs=resident_rhs)
    return out[:n, :nclass]


# ------------------------------- reference ----------------------------------

def gcnii_reference(params, x, g, *, lamda, alpha, variant,
                    matmul_dtype=jnp.float32):
    """Pure-JAX module math. matmul_dtype sets the operand precision of the
    matmuls (to optionally match the kernel's bf16 MXU operands); accumulation
    and all other math stay f32."""
    def mm(a, b):
        return jnp.dot(a.astype(matmul_dtype), b.astype(matmul_dtype),
                       preferred_element_type=jnp.float32,
                       precision=jax.lax.Precision.HIGHEST)

    h = jnp.maximum(mm(x, params["w_fc0"]) + params["b_fc0"], 0.0)
    h0 = h
    for i, w in enumerate(params["conv_ws"]):
        theta = math.log(lamda / (i + 1) + 1.0)
        hi = mm(g, h)
        if variant:
            support = jnp.concatenate([hi, h0], axis=1)
            r = (1 - alpha) * hi + alpha * h0
        else:
            support = (1 - alpha) * hi + alpha * h0
            r = support
        h = jnp.maximum(theta * mm(support, w) + (1 - theta) * r, 0.0)
    return mm(h, params["w_fc1"]) + params["b_fc1"]


# ---------------------------------- main -------------------------------------

if __name__ == "__main__":
    def run_case(n, nfeat, nhidden, nclass, nlayers, lamda, alpha, variant, key):
        k_x, k_g, k_p = jax.random.split(key, 3)
        x = jax.random.normal(k_x, (n, nfeat), jnp.float32)

        # symmetric, self-looped, row-normalized dense propagation matrix G
        a = (jax.random.uniform(k_g, (n, n)) < 0.1).astype(jnp.float32)
        a = jnp.maximum(a, a.T) + jnp.eye(n, dtype=jnp.float32)
        g = a / jnp.sum(a, axis=1, keepdims=True)

        params = init_params(k_p, nfeat, nlayers, nhidden, nclass, variant)
        fwd = jax.jit(functools.partial(gcnii_forward, lamda=lamda, alpha=alpha,
                                        variant=variant))
        out = jax.block_until_ready(fwd(params, x, a, g))
        assert out.shape == (n, nclass), out.shape

        # numerics-matched check (bf16 matmul operands, f32 accumulation)
        ref_bf = gcnii_reference(params, x, g, lamda=lamda, alpha=alpha,
                                 variant=variant, matmul_dtype=jnp.bfloat16)
        err_bf = float(jnp.max(jnp.abs(out - ref_bf)))
        assert jnp.allclose(out, ref_bf, atol=3e-2, rtol=3e-2), err_bf

        # module-semantics check against a pure float32 reference
        ref_f32 = gcnii_reference(params, x, g, lamda=lamda, alpha=alpha,
                                  variant=variant, matmul_dtype=jnp.float32)
        err_f32 = float(jnp.max(jnp.abs(out - ref_f32)))
        assert jnp.allclose(out, ref_f32, atol=1e-1, rtol=1e-1), err_f32

    keys = jax.random.split(jax.random.PRNGKey(0), 4)
    # small graphs: fully-fused single pallas_call (grid over layers)
    run_case(64, 32, 32, 8, 4, 0.5, 0.1, False, keys[0])
    run_case(130, 48, 64, 7, 3, 0.5, 0.1, True, keys[1])
    # larger graphs: tiled path with resident rhs
    run_case(600, 32, 32, 8, 3, 0.5, 0.1, True, keys[2])     # grid (2, 1)
    run_case(1300, 64, 96, 10, 3, 0.5, 0.2, False, keys[3])  # grid (3, 3), multi-K
    print("KERNEL_OK")
</pallas_src>

<mosaic_0001>
module attributes {stable_mosaic.version = 11 : i64} {
  func.func @_fused_small_kernel(%arg0: i32, %arg1: memref<128x128xbf16, #tpu.memory_space<vmem>>, %arg2: memref<128x128xbf16, #tpu.memory_space<vmem>>, %arg3: memref<1x128xf32, #tpu.memory_space<vmem>>, %arg4: memref<128x128xbf16, #tpu.memory_space<vmem>>, %arg5: memref<1x256x128xbf16, #tpu.memory_space<vmem>>, %arg6: memref<128x128xbf16, #tpu.memory_space<vmem>>, %arg7: memref<1x128xf32, #tpu.memory_space<vmem>>, %arg8: memref<128x128xf32, #tpu.memory_space<vmem>>, %arg9: memref<128x128xbf16, #tpu.memory_space<vmem>>, %arg10: memref<128x128xbf16, #tpu.memory_space<vmem>>) attributes {dimension_semantics = [#tpu.dimension_semantics<arbitrary>], iteration_bounds = array<i64: 4>, scalar_prefetch = 0 : i64, scratch_operands = 2 : i64, tpu.core_type = #tpu.core_type<tc>, window_params = [{pipeline_mode = #tpu.pipeline_mode<synchronous>, transform_indices = @transform_0, window_bounds = array<i64: 128, 128>}, {pipeline_mode = #tpu.pipeline_mode<synchronous>, transform_indices = @transform_1, window_bounds = array<i64: 128, 128>}, {pipeline_mode = #tpu.pipeline_mode<synchronous>, transform_indices = @transform_2, window_bounds = array<i64: 1, 128>}, {pipeline_mode = #tpu.pipeline_mode<synchronous>, transform_indices = @transform_3, window_bounds = array<i64: 128, 128>}, {transform_indices = @transform_4, window_bounds = array<i64: 1, 256, 128>}, {pipeline_mode = #tpu.pipeline_mode<synchronous>, transform_indices = @transform_5, window_bounds = array<i64: 128, 128>}, {pipeline_mode = #tpu.pipeline_mode<synchronous>, transform_indices = @transform_6, window_bounds = array<i64: 1, 128>}, {pipeline_mode = #tpu.pipeline_mode<synchronous>, transform_indices = @transform_7, window_bounds = array<i64: 128, 128>}]} {
    %c0_i32 = arith.constant 0 : i32
    %0 = arith.cmpi eq, %arg0, %c0_i32 : i32
    %1 = arith.extui %0 : i1 to i32
    %c0_i32_0 = arith.constant 0 : i32
    %2 = arith.cmpi ne, %1, %c0_i32_0 : i32
    scf.if %2 {
      %c0_14 = arith.constant 0 : index
      %c0_15 = arith.constant 0 : index
      %19 = vector.load %arg1[%c0_14, %c0_15] : memref<128x128xbf16, #tpu.memory_space<vmem>>, vector<128x128xbf16>
      %c0_16 = arith.constant 0 : index
      %c0_17 = arith.constant 0 : index
      %20 = vector.load %arg2[%c0_16, %c0_17] : memref<128x128xbf16, #tpu.memory_space<vmem>>, vector<128x128xbf16>
      %cst_18 = arith.constant dense<0.000000e+00> : vector<128x128xf32>
      %21 = tpu.matmul %19, %20, %cst_18 {dimension_numbers = #tpu.dot_dimension_numbers<[1], [0], [0], [1], [0, 0, 1, 1], [], []>} : vector<128x128xbf16>, vector<128x128xbf16>, vector<128x128xf32> -> vector<128x128xf32>
      %c0_19 = arith.constant 0 : index
      %c0_20 = arith.constant 0 : index
      %22 = vector.load %arg3[%c0_19, %c0_20] : memref<1x128xf32, #tpu.memory_space<vmem>>, vector<1x128xf32>
      %23 = vector.broadcast %22 : vector<1x128xf32> to vector<128x128xf32>
      %24 = arith.addf %21, %23 : vector<128x128xf32>
      %cst_21 = arith.constant 0.000000e+00 : f32
      %25 = vector.broadcast %cst_21 : f32 to vector<128x128xf32>
      %26 = arith.maximumf %24, %25 : vector<128x128xf32>
      %27 = arith.truncf %26 : vector<128x128xf32> to vector<128x128xbf16>
      %c0_22 = arith.constant 0 : index
      %c0_23 = arith.constant 0 : index
      %28 = vector.load %arg10[%c0_22, %c0_23] : memref<128x128xbf16, #tpu.memory_space<vmem>>, vector<128x128xbf16>
      tpu.vector_store %arg10[%c0_22, %c0_23], %27 {strides = array<i32>} : memref<128x128xbf16, #tpu.memory_space<vmem>>, vector<128x128xbf16>,
      %c0_24 = arith.constant 0 : index
      %c0_25 = arith.constant 0 : index
      %29 = vector.load %arg9[%c0_24, %c0_25] : memref<128x128xbf16, #tpu.memory_space<vmem>>, vector<128x128xbf16>
      tpu.vector_store %arg9[%c0_24, %c0_25], %27 {strides = array<i32>} : memref<128x128xbf16, #tpu.memory_space<vmem>>, vector<128x128xbf16>,
    } else {
    }
    %c0 = arith.constant 0 : index
    %c0_1 = arith.constant 0 : index
    %3 = vector.load %arg4[%c0, %c0_1] : memref<128x128xbf16, #tpu.memory_space<vmem>>, vector<128x128xbf16>
    %c0_2 = arith.constant 0 : index
    %c0_3 = arith.constant 0 : index
    %4 = vector.load %arg9[%c0_2, %c0_3] : memref<128x128xbf16, #tpu.memory_space<vmem>>, vector<128x128xbf16>
    %cst = arith.constant dense<0.000000e+00> : vector<128x128xf32>
    %5 = tpu.matmul %3, %4, %cst {dimension_numbers = #tpu.dot_dimension_numbers<[1], [0], [0], [1], [0, 0, 1, 1], [], []>} : vector<128x128xbf16>, vector<128x128xbf16>, vector<128x128xf32> -> vector<128x128xf32>
    %6 = arith.truncf %5 : vector<128x128xf32> to vector<128x128xbf16>
    %c0_4 = arith.constant 0 : index
    %c0_5 = arith.constant 0 : index
    %7 = vector.load %arg10[%c0_4, %c0_5] : memref<128x128xbf16, #tpu.memory_space<vmem>>, vector<128x128xbf16>
    %8 = tpu.concatenate %6, %7 in 1 : vector<128x128xbf16>, vector<128x128xbf16> -> vector<128x256xbf16>
    %c0_6 = arith.constant 0 : index
    %c0_7 = arith.constant 0 : index
    %c0_8 = arith.constant 0 : index
    %9 = vector.load %arg5[%c0_6, %c0_7, %c0_8] : memref<1x256x128xbf16, #tpu.memory_space<vmem>>, vector<1x256x128xbf16>
    %10 = vector.shape_cast %9 : vector<1x256x128xbf16> to vector<256x128xbf16>
    %cst_9 = arith.constant dense<0.000000e+00> : vector<128x128xf32>
    %11 = tpu.matmul %8, %10, %cst_9 {dimension_numbers = #tpu.dot_dimension_numbers<[1], [0], [0], [1], [0, 0, 1, 1], [], []>} : vector<128x256xbf16>, vector<256x128xbf16>, vector<128x128xf32> -> vector<128x128xf32>
    %cst_10 = arith.constant 0.000000e+00 : f32
    %12 = vector.broadcast %cst_10 : f32 to vector<128x128xf32>
    %13 = arith.maximumf %11, %12 : vector<128x128xf32>
    %14 = arith.truncf %13 : vector<128x128xf32> to vector<128x128xbf16>
    %c0_11 = arith.constant 0 : index
    %c0_12 = arith.constant 0 : index
    %15 = vector.load %arg9[%c0_11, %c0_12] : memref<128x128xbf16, #tpu.memory_space<vmem>>, vector<128x128xbf16>
    tpu.vector_store %arg9[%c0_11, %c0_12], %14 {strides = array<i32>} : memref<128x128xbf16, #tpu.memory_space<vmem>>, vector<128x128xbf16>,
    %c3_i32 = arith.constant 3 : i32
    %16 = arith.cmpi eq, %arg0, %c3_i32 : i32
    %17 = arith.extui %16 : i1 to i32
    %c0_i32_13 = arith.constant 0 : i32
    %18 = arith.cmpi ne, %17, %c0_i32_13 : i32
    scf.if %18 {
      %19 = arith.truncf %13 : vector<128x128xf32> to vector<128x128xbf16>
      %c0_14 = arith.constant 0 : index
      %c0_15 = arith.constant 0 : index
      %20 = vector.load %arg6[%c0_14, %c0_15] : memref<128x128xbf16, #tpu.memory_space<vmem>>, vector<128x128xbf16>
      %cst_16 = arith.constant dense<0.000000e+00> : vector<128x128xf32>
      %21 = tpu.matmul %19, %20, %cst_16 {dimension_numbers = #tpu.dot_dimension_numbers<[1], [0], [0], [1], [0, 0, 1, 1], [], []>} : vector<128x128xbf16>, vector<128x128xbf16>, vector<128x128xf32> -> vector<128x128xf32>
      %c0_17 = arith.constant 0 : index
      %c0_18 = arith.constant 0 : index
      %22 = vector.load %arg7[%c0_17, %c0_18] : memref<1x128xf32, #tpu.memory_space<vmem>>, vector<1x128xf32>
      %23 = vector.broadcast %22 : vector<1x128xf32> to vector<128x128xf32>
      %24 = arith.addf %21, %23 : vector<128x128xf32>
      %c0_19 = arith.constant 0 : index
      %c0_20 = arith.constant 0 : index
      %25 = vector.load %arg8[%c0_19, %c0_20] : memref<128x128xf32, #tpu.memory_space<vmem>>, vector<128x128xf32>
      tpu.vector_store %arg8[%c0_19, %c0_20], %24 {strides = array<i32>} : memref<128x128xf32, #tpu.memory_space<vmem>>, vector<128x128xf32>,
    } else {
    }
    return
  }
  func.func @transform_0(%arg0: i32) -> (i32, i32) {
    %c0_i32 = arith.constant 0 : i32
    %c0_i32_0 = arith.constant 0 : i32
    %c0_i32_1 = arith.constant 0 : i32
    return %c0_i32, %c0_i32_0 : i32, i32
  }
  func.func @transform_1(%arg0: i32) -> (i32, i32) {
    %c0_i32 = arith.constant 0 : i32
    %c0_i32_0 = arith.constant 0 : i32
    %c0_i32_1 = arith.constant 0 : i32
    return %c0_i32, %c0_i32_0 : i32, i32
  }
  func.func @transform_2(%arg0: i32) -> (i32, i32) {
    %c0_i32 = arith.constant 0 : i32
    %c0_i32_0 = arith.constant 0 : i32
    %c0_i32_1 = arith.constant 0 : i32
    return %c0_i32, %c0_i32_0 : i32, i32
  }
  func.func @transform_3(%arg0: i32) -> (i32, i32) {
    %c0_i32 = arith.constant 0 : i32
    %c0_i32_0 = arith.constant 0 : i32
    %c0_i32_1 = arith.constant 0 : i32
    return %c0_i32, %c0_i32_0 : i32, i32
  }
  func.func @transform_4(%arg0: i32) -> (i32, i32, i32) {
    %c0_i32 = arith.constant 0 : i32
    %c0_i32_0 = arith.constant 0 : i32
    %c0_i32_1 = arith.constant 0 : i32
    return %arg0, %c0_i32, %c0_i32_0 : i32, i32, i32
  }
  func.func @transform_5(%arg0: i32) -> (i32, i32) {
    %c0_i32 = arith.constant 0 : i32
    %c0_i32_0 = arith.constant 0 : i32
    %c0_i32_1 = arith.constant 0 : i32
    return %c0_i32, %c0_i32_0 : i32, i32
  }
  func.func @transform_6(%arg0: i32) -> (i32, i32) {
    %c0_i32 = arith.constant 0 : i32
    %c0_i32_0 = arith.constant 0 : i32
    %c0_i32_1 = arith.constant 0 : i32
    return %c0_i32, %c0_i32_0 : i32, i32
  }
  func.func @transform_7(%arg0: i32) -> (i32, i32) {
    %c0_i32 = arith.constant 0 : i32
    %c0_i32_0 = arith.constant 0 : i32
    %c0_i32_1 = arith.constant 0 : i32
    return %c0_i32, %c0_i32_0 : i32, i32
  }
}

</mosaic_0001>

<bundles_post_ra>
// kernel: gcnii_forward.1
= control target key start
LH: loop header
LB: loop body
LE: loop exit
PB: predicated region body
PF: predicated region fallthrough
CT: control target
= control target key end

     0   :  { %s1620_s24 = smov 0   ;;  %s1828_s0 = inlined_call_operand.vmem [shape: bf16[128,128], index: 0, kind: input, shape index: {}]   ;;  %s1829_s1 = inlined_call_operand.vmem [shape: bf16[128,128], index: 1, kind: input, shape index: {}]   ;;  %s1830_s2 = inlined_call_operand.vmem [shape: f32[1,128], index: 2, kind: input, shape index: {}]   ;;  %s1831_s3 = inlined_call_operand.vmem [shape: bf16[128,128], index: 3, kind: input, shape index: {}]   ;;  %s1832_s4 = inlined_call_operand.vmem [shape: bf16[4,256,128], index: 4, kind: input, shape index: {}]   ;;  %s1833_s5 = inlined_call_operand.vmem [shape: bf16[128,128], index: 5, kind: input, shape index: {}]   ;;  %s1834_s6 = inlined_call_operand.vmem [shape: f32[1,128], index: 6, kind: input, shape index: {}]   ;;  %s1835_s7 = inlined_call_operand.vmem [shape: f32[128,128], index: 7, kind: output, shape index: {}]  }
   0x1 LB: > { %s1626_s25 = sadd.s32 4294967295, %s1578_s24   ;;  %p1202_p0 = scmp.ge.s32.totalorder %s1578_s24, 1  ;;  %s1578_s24 = sphi %s1620_s24, %s17_s24  }
   0x2   : > { %p232_p1 = scmp.lt.s32.totalorder %s1578_s24, 5 }
   0x4   : > { %p233_p2 = pnand %p1202_p0, %p232_p1 }
   0x5   : > { %p259_p3 = scmp.lt.s32.totalorder (!%p233_p2), %s1626_s25, 3  ;;  %p1205_p4 = scmp.ne.s32.totalorder (!%p233_p2), %s1626_s25, 0 }
   0x6   : > { %236 = sbr.rel (%p233_p2) target bundleno = 1016 (0x3f8), region = 48 }
   0xd   : > { %s260_s26 = scalar_select %p259_p3, %s1626_s25, 3 }
   0xe   : > { %268 = sbr.rel (%p1205_p4) target bundleno = 279 (0x117), region = 52  ;;  %v1524_v0 = vld [vmem:[%s1829_s1] sm:$0xff] (!%p1205_p4)   ;;  %v1525_v1 = vld [vmem:[%s1829_s1 + $0x8] sm:$0xff] (!%p1205_p4)   ;;  %v1526_v2 = vld [vmem:[%s1829_s1 + $0x10] sm:$0xff] (!%p1205_p4)  }
   0xf   : > { %s1259_s27 = sshll.u32 %s260_s26, 7  ;;  %1372 = vmatprep.subr.bf16.mxu0 (!%p1205_p4), %v1524_v0  ;;  %1468 = vmatprep.subr.bf16.mxu1 (!%p1205_p4), %v1524_v0  ;;  %v1527_v3 = vld [vmem:[%s1829_s1 + $0x18] sm:$0xff] (!%p1205_p4)   ;;  %v1532_v4 = vld [vmem:[%s1828_s0] sm:$0xff] (!%p1205_p4)   ;;  %v1529_v7 = vld [vmem:[%s1829_s1 + $0x28] sm:$0xff] (!%p1205_p4)  }
  0x10   : > { %s1635_s30 = scalar_lea.vmem %s1832_s4, %s1259_s27  ;;  %1373 = vmatpush3.bf16.msra.mxu0 (!%p1205_p4), %v1524_v0  ;;  %1476 = vmatpush3.bf16.msra.mxu1 (!%p1205_p4), %v1524_v0  ;;  %v1533_v5 = vld [vmem:[%s1828_s0 + $0x20] sm:$0xff] (!%p1205_p4)   ;;  %v1530_v8 = vld [vmem:[%s1829_s1 + $0x30] sm:$0xff] (!%p1205_p4)   ;;  %v1531_v9 = vld [vmem:[%s1829_s1 + $0x38] sm:$0xff] (!%p1205_p4)  }
  0x11   : > { %1374 = vmatprep.subr.bf16.mxu0 (!%p1205_p4), %v1525_v1  ;;  %1469 = vmatprep.subr.bf16.mxu1 (!%p1205_p4), %v1525_v1  ;;  %v1528_v6 = vld [vmem:[%s1829_s1 + $0x20] sm:$0xff] (!%p1205_p4)   ;;  %v1534_v10 = vld [vmem:[%s1828_s0 + $0x8] sm:$0xff] (!%p1205_p4)   ;;  %v1536_v12 = vld [vmem:[%s1828_s0 + $0x10] sm:$0xff] (!%p1205_p4)  }
  0x12   : > { %1388 = vmatprep.mubr.bf16.mxu0 (!%p1205_p4), %v1532_v4  ;;  %1396 = vmatprep.mubr.bf16.mxu1 (!%p1205_p4), %v1533_v5  ;;  %v1535_v11 = vld [vmem:[%s1828_s0 + $0x28] sm:$0xff] (!%p1205_p4)   ;;  %v1537_v13 = vld [vmem:[%s1828_s0 + $0x30] sm:$0xff] (!%p1205_p4)   ;;  %v1538_v14 = vld [vmem:[%s1828_s0 + $0x18] sm:$0xff] (!%p1205_p4)  }
  0x13   : > { %v1539_v15 = vld [vmem:[%s1828_s0 + $0x38] sm:$0xff] (!%p1205_p4)   ;;  %v1206_v16 = vld [vmem:[%s1830_s2] ss:$0 sm:$0xff] (!%p1205_p4) }
  0x14   : > { %1375 = vmatpush3.bf16.msra.mxu0 (!%p1205_p4), %v1525_v1  ;;  %1477 = vmatpush3.bf16.msra.mxu1 (!%p1205_p4), %v1525_v1 }
  0x15   : > { %1376 = vmatprep.subr.bf16.mxu0 %v1526_v2  ;;  %1470 = vmatprep.subr.bf16.mxu1 %v1526_v2 }
  0x18   : > { %1377 = vmatpush3.bf16.msra.mxu0 %v1526_v2  ;;  %1478 = vmatpush3.bf16.msra.mxu1 %v1526_v2 }
  0x19   : > { %1378 = vmatprep.subr.bf16.mxu0 %v1527_v3  ;;  %1471 = vmatprep.subr.bf16.mxu1 %v1527_v3 }
  0x1c   : > { %1379 = vmatpush3.bf16.msra.mxu0 %v1527_v3  ;;  %1479 = vmatpush3.bf16.msra.mxu1 %v1527_v3 }
  0x1d   : > { %1380 = vmatprep.subr.bf16.mxu0 %v1528_v6  ;;  %1472 = vmatprep.subr.bf16.mxu1 %v1528_v6 }
  0x20   : > { %1381 = vmatpush3.bf16.msra.mxu0 %v1528_v6  ;;  %1480 = vmatpush3.bf16.msra.mxu1 %v1528_v6 }
  0x21   : > { %1382 = vmatprep.subr.bf16.mxu0 %v1529_v7  ;;  %1473 = vmatprep.subr.bf16.mxu1 %v1529_v7 }
  0x24   : > { %1383 = vmatpush3.bf16.msra.mxu0 %v1529_v7  ;;  %1481 = vmatpush3.bf16.msra.mxu1 %v1529_v7 }
  0x25   : > { %1384 = vmatprep.subr.bf16.mxu0 %v1530_v8  ;;  %1474 = vmatprep.subr.bf16.mxu1 %v1530_v8 }
  0x28   : > { %1385 = vmatpush3.bf16.msra.mxu0 %v1530_v8  ;;  %1482 = vmatpush3.bf16.msra.mxu1 %v1530_v8 }
  0x29   : > { %1386 = vmatprep.subr.bf16.mxu0 %v1531_v9  ;;  %1475 = vmatprep.subr.bf16.mxu1 %v1531_v9 }
  0x2c   : > { %1387 = vmatpush3.bf16.msra.mxu0 %v1531_v9  ;;  %1483 = vmatpush3.bf16.msra.mxu1 %v1531_v9 }
  0x2f   : > { %1389 = vmatmul.mubr.bf16.vlgmr.msra.gmra.mrb[0].mxu0 %v1534_v10  ;;  %1397 = vmatmul.mubr.bf16.vlgmr.msra.gmra.mrb[0].mxu1 %v1535_v11 }
  0x30   : > { %1392 = vmatprep.mubr.bf16.mxu0 %v1536_v12  ;;  %1400 = vmatprep.mubr.bf16.mxu1 %v1537_v13 }
  0x37   : > { %1393 = vmatmul.mubr.bf16.gmra.mrb[4].mxu0 %v1538_v14  ;;  %1401 = vmatmul.mubr.bf16.gmra.mrb[4].mxu1 %v1539_v15 }
 0x102   : > { %v1390_v17 = vpop.f32.mrb[0].mxu0  ;;  %v1398_v18 = vpop.f32.mrb[0].mxu1 }
 0x103   : > { %v447_v19 = vadd.f32 %v1390_v17, %v1206_v16  ;;  %v479_v20 = vadd.f32 %v1398_v18, %v1206_v16  ;;  %v438_v21 = vpop.f32.mrb[1].mxu0  ;;  %v470_v22 = vpop.f32.mrb[1].mxu1 }
 0x104   : > { %v439_v23 = vadd.f32 %v1206_v16, %v438_v21  ;;  %v471_v24 = vadd.f32 %v1206_v16, %v470_v22  ;;  %v1391_v25 = vpop.f32.mrb[2].mxu0  ;;  %v1399_v26 = vpop.f32.mrb[2].mxu1 }
 0x105   : > { %v450_v27 = vadd.f32 %v1391_v25, %v1206_v16  ;;  %v482_v28 = vadd.f32 %v1399_v26, %v1206_v16  ;;  %v441_v29 = vpop.f32.mrb[3].mxu0  ;;  %v473_v30 = vpop.f32.mrb[3].mxu1  ;;  %v503_v33 = vmax.f32 %v447_v19, 0.0  ;;  %v511_v34 = vmax.f32 %v479_v20, 0.0 }
 0x106   : > { %v442_v31 = vadd.f32 %v1206_v16, %v441_v29  ;;  %v474_v32 = vadd.f32 %v1206_v16, %v473_v30  ;;  %v501_v37 = vmax.f32 %v439_v23, 0.0  ;;  %v509_v38 = vmax.f32 %v471_v24, 0.0 }
 0x107   : > { %v504_v35 = vmax.f32 %v450_v27, 0.0  ;;  %v512_v36 = vmax.f32 %v482_v28, 0.0 }
 0x108   : > { %v502_v39 = vmax.f32 %v442_v31, 0.0  ;;  %v510_v40 = vmax.f32 %v474_v32, 0.0 }
 0x109   : > { %v518_v41 = vpack.c.bf16 %v504_v35, %v503_v33  ;;  %v522_v42 = vpack.c.bf16 %v512_v36, %v511_v34 }
 0x10a   : > { %v517_v43 = vpack.c.bf16 %v502_v39, %v501_v37  ;;  %v521_v44 = vpack.c.bf16 %v510_v40, %v509_v38  ;;  %v1394_v45 = vpop.f32.mrb[4].mxu0  ;;  %v1402_v46 = vpop.f32.mrb[4].mxu1 }
 0x10b   : > { %526 = vst [vmem:[#allocation3 + $0x8] sm:$0xff] %v518_v41  ;;  %534 = vst [vmem:[#allocation2 + $0x8] sm:$0xff] %v518_v41  ;;  %v463_v47 = vadd.f32 %v1394_v45, %v1206_v16  ;;  %v495_v48 = vadd.f32 %v1402_v46, %v1206_v16  ;;  %v454_v49 = vpop.f32.mrb[5].mxu0  ;;  %v486_v50 = vpop.f32.mrb[5].mxu1 }
 0x10c   : > { %530 = vst [vmem:[#allocation3 + $0x28] sm:$0xff] %v522_v42  ;;  %538 = vst [vmem:[#allocation2 + $0x28] sm:$0xff] %v522_v42  ;;  %v455_v51 = vadd.f32 %v1206_v16, %v454_v49  ;;  %v487_v52 = vadd.f32 %v1206_v16, %v486_v50  ;;  %v1395_v53 = vpop.f32.mrb[6].mxu0  ;;  %v1403_v54 = vpop.f32.mrb[6].mxu1 }
 0x10d   : > { %525 = vst [vmem:[#allocation3] sm:$0xff] %v517_v43  ;;  %533 = vst [vmem:[#allocation2] sm:$0xff] %v517_v43  ;;  %v466_v55 = vadd.f32 %v1395_v53, %v1206_v16  ;;  %v498_v56 = vadd.f32 %v1403_v54, %v1206_v16  ;;  %v457_v57 = vpop.f32.mrb[7].mxu0  ;;  %v489_v58 = vpop.f32.mrb[7].mxu1  ;;  %v507_v61 = vmax.f32 %v463_v47, 0.0  ;;  %v515_v62 = vmax.f32 %v495_v48, 0.0 }
 0x10e   : > { %529 = vst [vmem:[#allocation3 + $0x20] sm:$0xff] %v521_v44  ;;  %537 = vst [vmem:[#allocation2 + $0x20] sm:$0xff] %v521_v44  ;;  %v458_v59 = vadd.f32 %v1206_v16, %v457_v57  ;;  %v490_v60 = vadd.f32 %v1206_v16, %v489_v58  ;;  %v505_v1 = vmax.f32 %v455_v51, 0.0  ;;  %v513_v2 = vmax.f32 %v487_v52, 0.0 }
 0x10f   : > { %v508_v63 = vmax.f32 %v466_v55, 0.0  ;;  %v516_v0 = vmax.f32 %v498_v56, 0.0 }
 0x110   : > { %v506_v3 = vmax.f32 %v458_v59, 0.0  ;;  %v514_v4 = vmax.f32 %v490_v60, 0.0 }
 0x111   : > { %v520_v5 = vpack.c.bf16 %v508_v63, %v507_v61  ;;  %v524_v6 = vpack.c.bf16 %v516_v0, %v515_v62 }
 0x112   : > { %v519_v7 = vpack.c.bf16 %v506_v3, %v505_v1  ;;  %v523_v8 = vpack.c.bf16 %v514_v4, %v513_v2 }
 0x113   : > { %528 = vst [vmem:[#allocation3 + $0x18] sm:$0xff] %v520_v5  ;;  %536 = vst [vmem:[#allocation2 + $0x18] sm:$0xff] %v520_v5 }
 0x114   : > { %532 = vst [vmem:[#allocation3 + $0x38] sm:$0xff] %v524_v6  ;;  %540 = vst [vmem:[#allocation2 + $0x38] sm:$0xff] %v524_v6 }
 0x115   : > { %527 = vst [vmem:[#allocation3 + $0x10] sm:$0xff] %v519_v7  ;;  %535 = vst [vmem:[#allocation2 + $0x10] sm:$0xff] %v519_v7 }
 0x116   : > { %531 = vst [vmem:[#allocation3 + $0x30] sm:$0xff] %v523_v8  ;;  %539 = vst [vmem:[#allocation2 + $0x30] sm:$0xff] %v523_v8 }
 0x117 PF: > { %v557_v9 = vld [vmem:[#allocation2] sm:$0xff]  ;;  %v558_v10 = vld [vmem:[#allocation2 + $0x8] sm:$0xff]  ;;  %v1552_v20 = vld [vmem:[%s1635_s30 + $0x50] sm:$0xff]   ;;  %p1247_p5 = scmp.ne.s32.totalorder %s1626_s25, 3 }
 0x118   : > { %1404 = vmatprep.subr.bf16.mxu0 %v557_v9  ;;  %v1540_v11 = vld [vmem:[%s1831_s3] sm:$0xff]   ;;  %v1550_v17 = vld [vmem:[%s1635_s30 + $0x48] sm:$0xff]   ;;  %v1553_v22 = vld [vmem:[%s1635_s30 + $0x10] sm:$0xff]  }
 0x119   : > { %1405 = vmatpush3.bf16.msra.mxu0 %v557_v9  ;;  %1420 = vmatprep.mubr.bf16.mxu0 %v1540_v11  ;;  %v561_v14 = vld [vmem:[#allocation2 + $0x20] sm:$0xff]  ;;  %v562_v18 = vld [vmem:[#allocation2 + $0x28] sm:$0xff]  ;;  %v1554_v23 = vld [vmem:[%s1635_s30 + $0x58] sm:$0xff]  }
 0x11a   : > { %1406 = vmatprep.subr.bf16.mxu0 %v558_v10  ;;  %v560_v13 = vld [vmem:[#allocation2 + $0x18] sm:$0xff]  ;;  %v1548_v15 = vld [vmem:[%s1635_s30 + $0x40] sm:$0xff]   ;;  %v1551_v19 = vld [vmem:[%s1635_s30 + $0x8] sm:$0xff]  }
 0x11b   : > { %v1549_v16 = vld [vmem:[%s1635_s30] sm:$0xff]   ;;  %1484 = vmatprep.subr.bf16.mxu1 %v1548_v15  ;;  %v564_v24 = vld [vmem:[#allocation2 + $0x38] sm:$0xff]  ;;  %v1541_v28 = vld [vmem:[%s1831_s3 + $0x8] sm:$0xff]  }
 0x11c   : > { %v559_v12 = vld [vmem:[#allocation2 + $0x10] sm:$0xff]  ;;  %1492 = vmatpush3.bf16.msra.mxu1 %v1549_v16  ;;  %v1555_v25 = vld [vmem:[%s1635_s30 + $0x18] sm:$0xff]   ;;  %v1556_v26 = vld [vmem:[%s1635_s30 + $0x60] sm:$0xff]  }
 0x11d   : > { %1407 = vmatpush3.bf16.msra.mxu0 %v558_v10  ;;  %1485 = vmatprep.subr.bf16.mxu1 %v1550_v17  ;;  %v563_v21 = vld [vmem:[#allocation2 + $0x30] sm:$0xff]  ;;  %v1557_v27 = vld [vmem:[%s1635_s30 + $0x20] sm:$0xff]   ;;  %v1558_v29 = vld [vmem:[%s1635_s30 + $0x68] sm:$0xff]  }
 0x11e   : > { %1408 = vmatprep.subr.bf16.mxu0 %v559_v12  ;;  %v1542_v30 = vld [vmem:[%s1831_s3 + $0x10] sm:$0xff]   ;;  %v1559_v31 = vld [vmem:[%s1635_s30 + $0x28] sm:$0xff]   ;;  %v1543_v33 = vld [vmem:[%s1831_s3 + $0x18] sm:$0xff]  }
 0x11f   : > { %v1560_v32 = vld [vmem:[%s1635_s30 + $0x70] sm:$0xff]   ;;  %v1544_v35 = vld [vmem:[%s1831_s3 + $0x20] sm:$0xff]   ;;  %v1545_v36 = vld [vmem:[%s1831_s3 + $0x28] sm:$0xff]  }
 0x120   : > { %1493 = vmatpush3.bf16.msra.mxu1 %v1551_v19  ;;  %v1561_v34 = vld [vmem:[%s1635_s30 + $0x30] sm:$0xff]   ;;  %v1547_v38 = vld [vmem:[%s1831_s3 + $0x38] sm:$0xff]   ;;  %v718_v41 = vld [vmem:[#allocation3] sm:$0xff] }
 0x121   : > { %1409 = vmatpush3.bf16.msra.mxu0 %v559_v12  ;;  %1486 = vmatprep.subr.bf16.mxu1 %v1552_v20  ;;  %v1546_v37 = vld [vmem:[%s1831_s3 + $0x30] sm:$0xff]   ;;  %v1562_v39 = vld [vmem:[%s1635_s30 + $0x78] sm:$0xff]   ;;  %v719_v49 = vld [vmem:[#allocation3 + $0x8] sm:$0xff] }
 0x122   : > { %1410 = vmatprep.subr.bf16.mxu0 %v560_v13  ;;  %v1563_v40 = vld [vmem:[%s1635_s30 + $0x38] sm:$0xff]   ;;  %v720_v42 = vld [vmem:[#allocation3 + $0x10] sm:$0xff]  ;;  %v722_v63 = vld [vmem:[#allocation3 + $0x20] sm:$0xff] }
 0x123   : > { %902 = vmatprep.mubr.bf16.mxu1 %v720_v42  ;;  %v721_v56 = vld [vmem:[#allocation3 + $0x18] sm:$0xff]  ;;  %v723_v5 = vld [vmem:[#allocation3 + $0x28] sm:$0xff]  ;;  %v724_v7 = vld [vmem:[#allocation3 + $0x30] sm:$0xff] }
 0x124   : > { %1494 = vmatpush3.bf16.msra.mxu1 %v1553_v22  ;;  %v725_v8 = vld [vmem:[#allocation3 + $0x38] sm:$0xff] }
 0x125   : > { %1411 = vmatpush3.bf16.msra.mxu0 %v560_v13  ;;  %1487 = vmatprep.subr.bf16.mxu1 %v1554_v23 }
 0x126   : > { %1412 = vmatprep.subr.bf16.mxu0 %v561_v14 }
 0x128   : > { %1495 = vmatpush3.bf16.msra.mxu1 %v1555_v25 }
 0x129   : > { %1413 = vmatpush3.bf16.msra.mxu0 %v561_v14  ;;  %1488 = vmatprep.subr.bf16.mxu1 %v1556_v26 }
 0x12a   : > { %1414 = vmatprep.subr.bf16.mxu0 %v562_v18 }
 0x12c   : > { %1496 = vmatpush3.bf16.msra.mxu1 %v1557_v27 }
 0x12d   : > { %1415 = vmatpush3.bf16.msra.mxu0 %v562_v18  ;;  %1489 = vmatprep.subr.bf16.mxu1 %v1558_v29 }
 0x12e   : > { %1416 = vmatprep.subr.bf16.mxu0 %v563_v21 }
 0x130   : > { %1497 = vmatpush3.bf16.msra.mxu1 %v1559_v31 }
 0x131   : > { %1417 = vmatpush3.bf16.msra.mxu0 %v563_v21  ;;  %1490 = vmatprep.subr.bf16.mxu1 %v1560_v32 }
 0x132   : > { %1418 = vmatprep.subr.bf16.mxu0 %v564_v24 }
 0x134   : > { %1498 = vmatpush3.bf16.msra.mxu1 %v1561_v34 }
 0x135   : > { %1419 = vmatpush3.bf16.msra.mxu0 %v564_v24  ;;  %1491 = vmatprep.subr.bf16.mxu1 %v1562_v39 }
 0x136   : > { %1292 = vmatprep.subr.bf16.mxu0 %v1548_v15 }
 0x138   : > { %1421 = vmatmul.mubr.bf16.vlgmr.msra.gmra.mrb[0].mxu0 %v1541_v28  ;;  %1499 = vmatpush3.bf16.msra.mxu1 %v1563_v40 }
 0x139   : > { %1424 = vmatprep.mubr.bf16.mxu0 %v1542_v30  ;;  %1293 = vmatpush3.bf16.msra.mxu0 %v1549_v16 }
 0x13a   : > { %1294 = vmatprep.subr.bf16.mxu0 %v1550_v17 }
 0x13d   : > { %1295 = vmatpush3.bf16.msra.mxu0 %v1551_v19 }
 0x13e   : > { %1296 = vmatprep.subr.bf16.mxu0 %v1552_v20 }
 0x140   : > { %1425 = vmatmul.mubr.bf16.gmra.mrb[4].mxu0 %v1543_v33 }
 0x141   : > { %1428 = vmatprep.mubr.bf16.mxu0 %v1544_v35  ;;  %1297 = vmatpush3.bf16.msra.mxu0 %v1553_v22 }
 0x142   : > { %1298 = vmatprep.subr.bf16.mxu0 %v1554_v23 }
 0x145   : > { %1299 = vmatpush3.bf16.msra.mxu0 %v1555_v25 }
 0x146   : > { %1300 = vmatprep.subr.bf16.mxu0 %v1556_v26 }
 0x148   : > { %1429 = vmatmul.mubr.bf16.gmra.mrb[8].mxu0 %v1545_v36 }
 0x149   : > { %1432 = vmatprep.mubr.bf16.mxu0 %v1546_v37  ;;  %1301 = vmatpush3.bf16.msra.mxu0 %v1557_v27 }
 0x14a   : > { %1302 = vmatprep.subr.bf16.mxu0 %v1558_v29 }
 0x14d   : > { %1303 = vmatpush3.bf16.msra.mxu0 %v1559_v31 }
 0x14e   : > { %1304 = vmatprep.subr.bf16.mxu0 %v1560_v32 }
 0x150   : > { %1433 = vmatmul.mubr.bf16.gmra.mrb[12].mxu0 %v1547_v38 }
 0x151   : > { %1305 = vmatpush3.bf16.msra.mxu0 %v1561_v34  ;;  %886 = vmatprep.mubr.bf16.mxu0 %v718_v41 }
 0x152   : > { %1306 = vmatprep.subr.bf16.mxu0 %v1562_v39 }
 0x155   : > { %1307 = vmatpush3.bf16.msra.mxu0 %v1563_v40 }
 0x20b   : > { %v1422_v43 = vpop.f32.mrb[0].mxu0 }
 0x20c   : > { %v647_v44 = vpop.f32.mrb[1].mxu0 }
 0x20d   : > { %v1423_v45 = vpop.f32.mrb[2].mxu0 }
 0x20e   : > { %v711_v46 = vpack.c.bf16 %v1423_v45, %v1422_v43  ;;  %v650_v47 = vpop.f32.mrb[3].mxu0 }
 0x20f   : > { %v710_v48 = vpack.c.bf16 %v650_v47, %v647_v44 }
 0x211   : > { %887 = vmatmul.mubr.bf16.vlgmr.msra.gmra.mrb[16].mxu0 %v710_v48 }
 0x212   : > { %894 = vmatprep.mubr.bf16.mxu0 %v719_v49 }
 0x213   : > { %v1426_v50 = vpop.f32.mrb[4].mxu0 }
 0x214   : > { %v663_v51 = vpop.f32.mrb[5].mxu0 }
 0x215   : > { %v1427_v52 = vpop.f32.mrb[6].mxu0 }
 0x216   : > { %v713_v53 = vpack.c.bf16 %v1427_v52, %v1426_v50  ;;  %v666_v54 = vpop.f32.mrb[7].mxu0 }
 0x217   : > { %v712_v55 = vpack.c.bf16 %v666_v54, %v663_v51 }
 0x219   : > { %895 = vmatmul.mubr.bf16.gmra.mrb[20].mxu0 %v711_v46  ;;  %903 = vmatmul.mubr.bf16.vlgmr.msra.gmra.mrb[0].mxu1 %v712_v55 }
 0x21a   : > { %910 = vmatprep.mubr.bf16.mxu1 %v721_v56 }
 0x21b   : > { %v1430_v57 = vpop.f32.mrb[8].mxu0 }
 0x21c   : > { %v679_v58 = vpop.f32.mrb[9].mxu0 }
 0x21d   : > { %v1431_v59 = vpop.f32.mrb[10].mxu0 }
 0x21e   : > { %v715_v60 = vpack.c.bf16 %v1431_v59, %v1430_v57  ;;  %v682_v61 = vpop.f32.mrb[11].mxu0 }
 0x21f   : > { %v714_v62 = vpack.c.bf16 %v682_v61, %v679_v58 }
 0x221   : > { %911 = vmatmul.mubr.bf16.gmra.mrb[4].mxu1 %v713_v53 }
 0x222   : > { %918 = vmatprep.mubr.bf16.mxu1 %v722_v63 }
 0x223   : > { %v1434_v0 = vpop.f32.mrb[12].mxu0 }
 0x224   : > { %v695_v1 = vpop.f32.mrb[13].mxu0 }
 0x225   : > { %v1435_v2 = vpop.f32.mrb[14].mxu0 }
 0x226   : > { %v717_v3 = vpack.c.bf16 %v1435_v2, %v1434_v0  ;;  %v698_v4 = vpop.f32.mrb[15].mxu0 }
 0x227   : > { %v716_v6 = vpack.c.bf16 %v698_v4, %v695_v1 }
 0x229   : > { %919 = vmatmul.mubr.bf16.gmra.mrb[8].mxu1 %v714_v62 }
 0x22a   : > { %926 = vmatprep.mubr.bf16.mxu1 %v723_v5 }
 0x231   : > { %927 = vmatmul.mubr.bf16.gmra.mrb[12].mxu1 %v715_v60 }
 0x232   : > { %934 = vmatprep.mubr.bf16.mxu1 %v724_v7 }
 0x239   : > { %935 = vmatmul.mubr.bf16.gmra.mrb[16].mxu1 %v716_v6 }
 0x23a   : > { %942 = vmatprep.mubr.bf16.mxu1 %v725_v8 }
 0x241   : > { %943 = vmatmul.mubr.bf16.gmra.mrb[20].mxu1 %v717_v3 }
 0x2e4   : > { %v1308_v9 = vpop.f32.mrb[16].mxu0 }
 0x2e5   : > { %v1309_v10 = vpop.f32.mrb[17].mxu0 }
 0x2e6   : > { %v1310_v11 = vadd.f32 %v1309_v10, %v1308_v9  ;;  %v1311_v12 = vpop.f32.mrb[18].mxu0 }
 0x2e7   : > { %v1312_v13 = vpop.f32.mrb[19].mxu0 }
 0x2e8   : > { %v1313_v14 = vadd.f32 %v1312_v13, %v1311_v12  ;;  %v951_v15 = vmax.f32 %v1310_v11, 0.0 }
 0x2ea   : > { %v952_v16 = vmax.f32 %v1313_v14, 0.0 }
 0x2ec   : > { %v1729_v17 = vpack.c.bf16 %v952_v16, %v951_v15  ;;  %v1314_v18 = vpop.f32.mrb[20].mxu0  ;;  %v1320_v19 = vpop.f32.mrb[0].mxu1 }
 0x2ed   : > { %v1315_v20 = vpop.f32.mrb[21].mxu0  ;;  %v1321_v21 = vpop.f32.mrb[1].mxu1 }
 0x2ee   : > { %975 = vst [vmem:[#allocation2] sm:$0xff] %v1729_v17  ;;  %v1316_v22 = vadd.f32 %v1315_v20, %v1314_v18  ;;  %v1322_v23 = vadd.f32 %v1321_v21, %v1320_v19  ;;  %v1317_v24 = vpop.f32.mrb[22].mxu0  ;;  %v1323_v25 = vpop.f32.mrb[2].mxu1  ;;  %v1564_v18 = vld [vmem:[%s1833_s5] sm:$0xff] (!%p1247_p5)   ;;  %1452 = vmatprep.mubr.bf16.mxu0 (!%p1247_p5), %v1729_v17  ;;  %v1565_v19 = vld [vmem:[%s1833_s5 + $0x8] sm:$0xff] (!%p1247_p5)   ;;  %v1566_v20 = vld [vmem:[%s1833_s5 + $0x10] sm:$0xff] (!%p1247_p5)  }
 0x2ef   : > { %v1318_v26 = vpop.f32.mrb[23].mxu0  ;;  %v1324_v27 = vpop.f32.mrb[3].mxu1  ;;  %1436 = vmatprep.subr.bf16.mxu0 (!%p1247_p5), %v1564_v18  ;;  %1500 = vmatprep.subr.bf16.mxu1 (!%p1247_p5), %v1564_v18  ;;  %v1567_v17 = vld [vmem:[%s1833_s5 + $0x18] sm:$0xff] (!%p1247_p5)   ;;  %v1568_v21 = vld [vmem:[%s1833_s5 + $0x20] sm:$0xff] (!%p1247_p5)  }
 0x2f0   : > { %v1319_v28 = vadd.f32 %v1318_v26, %v1317_v24  ;;  %v1325_v29 = vadd.f32 %v1324_v27, %v1323_v25  ;;  %v953_v30 = vmax.f32 %v1316_v22, 0.0  ;;  %v955_v31 = vmax.f32 %v1322_v23, 0.0  ;;  %1437 = vmatpush3.bf16.msra.mxu0 (!%p1247_p5), %v1564_v18  ;;  %1508 = vmatpush3.bf16.msra.mxu1 (!%p1247_p5), %v1564_v18  ;;  %v1569_v22 = vld [vmem:[%s1833_s5 + $0x28] sm:$0xff] (!%p1247_p5)   ;;  %v1570_v23 = vld [vmem:[%s1833_s5 + $0x30] sm:$0xff] (!%p1247_p5)   ;;  %v1571_v24 = vld [vmem:[%s1833_s5 + $0x38] sm:$0xff] (!%p1247_p5)  }
 0x2f1   : > { %1438 = vmatprep.subr.bf16.mxu0 (!%p1247_p5), %v1565_v19  ;;  %1501 = vmatprep.subr.bf16.mxu1 (!%p1247_p5), %v1565_v19  ;;  %v1248_v25 = vld [vmem:[%s1834_s6] ss:$0 sm:$0xff] (!%p1247_p5) }
 0x2f2   : > { %v954_v32 = vmax.f32 %v1319_v28, 0.0  ;;  %v956_v33 = vmax.f32 %v1325_v29, 0.0 }
 0x2f4   : > { %v1732_v34 = vpack.c.bf16 %v954_v32, %v953_v30  ;;  %v1734_v35 = vpack.c.bf16 %v956_v33, %v955_v31  ;;  %v1326_v36 = vpop.f32.mrb[4].mxu1  ;;  %1439 = vmatpush3.bf16.msra.mxu0 (!%p1247_p5), %v1565_v19  ;;  %1509 = vmatpush3.bf16.msra.mxu1 (!%p1247_p5), %v1565_v19 }
 0x2f5   : > { %v1327_v37 = vpop.f32.mrb[5].mxu1  ;;  %1440 = vmatprep.subr.bf16.mxu0 (!%p1247_p5), %v1566_v20  ;;  %1502 = vmatprep.subr.bf16.mxu1 (!%p1247_p5), %v1566_v20 }
 0x2f6   : > { %976 = vst [vmem:[#allocation2 + $0x8] sm:$0xff] %v1732_v34  ;;  %977 = vst [vmem:[#allocation2 + $0x10] sm:$0xff] %v1734_v35  ;;  %v1328_v38 = vadd.f32 %v1327_v37, %v1326_v36  ;;  %v1329_v39 = vpop.f32.mrb[6].mxu1 }
 0x2f7   : > { %v1330_v40 = vpop.f32.mrb[7].mxu1 }
 0x2f8   : > { %v1331_v41 = vadd.f32 %v1330_v40, %v1329_v39  ;;  %v957_v42 = vmax.f32 %v1328_v38, 0.0  ;;  %1441 = vmatpush3.bf16.msra.mxu0 (!%p1247_p5), %v1566_v20  ;;  %1510 = vmatpush3.bf16.msra.mxu1 (!%p1247_p5), %v1566_v20 }
 0x2f9   : > { %1442 = vmatprep.subr.bf16.mxu0 (!%p1247_p5), %v1567_v17  ;;  %1503 = vmatprep.subr.bf16.mxu1 (!%p1247_p5), %v1567_v17 }
 0x2fa   : > { %v958_v43 = vmax.f32 %v1331_v41, 0.0 }
 0x2fc   : > { %v1738_v44 = vpack.c.bf16 %v958_v43, %v957_v42  ;;  %v1332_v45 = vpop.f32.mrb[8].mxu1  ;;  %1443 = vmatpush3.bf16.msra.mxu0 (!%p1247_p5), %v1567_v17  ;;  %1511 = vmatpush3.bf16.msra.mxu1 (!%p1247_p5), %v1567_v17 }
 0x2fd   : > { %v1333_v46 = vpop.f32.mrb[9].mxu1  ;;  %1444 = vmatprep.subr.bf16.mxu0 (!%p1247_p5), %v1568_v21  ;;  %1504 = vmatprep.subr.bf16.mxu1 (!%p1247_p5), %v1568_v21 }
 0x2fe   : > { %978 = vst [vmem:[#allocation2 + $0x18] sm:$0xff] %v1738_v44  ;;  %v1334_v47 = vadd.f32 %v1333_v46, %v1332_v45  ;;  %v1335_v48 = vpop.f32.mrb[10].mxu1 }
 0x2ff   : > { %v1336_v49 = vpop.f32.mrb[11].mxu1 }
 0x300   : > { %v1337_v50 = vadd.f32 %v1336_v49, %v1335_v48  ;;  %v959_v51 = vmax.f32 %v1334_v47, 0.0  ;;  %1445 = vmatpush3.bf16.msra.mxu0 (!%p1247_p5), %v1568_v21  ;;  %1512 = vmatpush3.bf16.msra.mxu1 (!%p1247_p5), %v1568_v21 }
 0x301   : > { %1446 = vmatprep.subr.bf16.mxu0 (!%p1247_p5), %v1569_v22  ;;  %1505 = vmatprep.subr.bf16.mxu1 (!%p1247_p5), %v1569_v22 }
 0x302   : > { %v960_v52 = vmax.f32 %v1337_v50, 0.0 }
 0x304   : > { %v971_v53 = vpack.c.bf16 %v960_v52, %v959_v51  ;;  %v1338_v54 = vpop.f32.mrb[12].mxu1  ;;  %1447 = vmatpush3.bf16.msra.mxu0 (!%p1247_p5), %v1569_v22  ;;  %1513 = vmatpush3.bf16.msra.mxu1 (!%p1247_p5), %v1569_v22 }
 0x305   : > { %v1339_v55 = vpop.f32.mrb[13].mxu1  ;;  %1448 = vmatprep.subr.bf16.mxu0 (!%p1247_p5), %v1570_v23  ;;  %1506 = vmatprep.subr.bf16.mxu1 (!%p1247_p5), %v1570_v23 }
 0x306   : > { %979 = vst [vmem:[#allocation2 + $0x20] sm:$0xff] %v971_v53  ;;  %v1340_v56 = vadd.f32 %v1339_v55, %v1338_v54  ;;  %v1341_v57 = vpop.f32.mrb[14].mxu1  ;;  %1460 = vmatprep.mubr.bf16.mxu1 (!%p1247_p5), %v971_v53 }
 0x307   : > { %v1342_v58 = vpop.f32.mrb[15].mxu1 }
 0x308   : > { %v1343_v59 = vadd.f32 %v1342_v58, %v1341_v57  ;;  %v961_v60 = vmax.f32 %v1340_v56, 0.0  ;;  %1449 = vmatpush3.bf16.msra.mxu0 (!%p1247_p5), %v1570_v23  ;;  %1514 = vmatpush3.bf16.msra.mxu1 (!%p1247_p5), %v1570_v23 }
 0x309   : > { %1450 = vmatprep.subr.bf16.mxu0 (!%p1247_p5), %v1571_v24  ;;  %1507 = vmatprep.subr.bf16.mxu1 (!%p1247_p5), %v1571_v24 }
 0x30a   : > { %v962_v61 = vmax.f32 %v1343_v59, 0.0 }
 0x30c   : > { %v1741_v62 = vpack.c.bf16 %v962_v61, %v961_v60  ;;  %v1344_v63 = vpop.f32.mrb[16].mxu1  ;;  %1451 = vmatpush3.bf16.msra.mxu0 (!%p1247_p5), %v1571_v24  ;;  %1515 = vmatpush3.bf16.msra.mxu1 (!%p1247_p5), %v1571_v24 }
 0x30d   : > { %v1345_v0 = vpop.f32.mrb[17].mxu1 }
 0x30e   : > { %980 = vst [vmem:[#allocation2 + $0x28] sm:$0xff] %v1741_v62  ;;  %v1346_v1 = vadd.f32 %v1345_v0, %v1344_v63  ;;  %v1347_v2 = vpop.f32.mrb[18].mxu1 }
 0x30f   : > { %v1348_v3 = vpop.f32.mrb[19].mxu1  ;;  %1453 = vmatmul.mubr.bf16.vlgmr.msra.gmra.mrb[0].mxu0 (!%p1247_p5), %v1732_v34  ;;  %1461 = vmatmul.mubr.bf16.vlgmr.msra.gmra.mrb[0].mxu1 (!%p1247_p5), %v1741_v62 }
 0x310   : > { %v1349_v4 = vadd.f32 %v1348_v3, %v1347_v2  ;;  %v963_v5 = vmax.f32 %v1346_v1, 0.0  ;;  %1456 = vmatprep.mubr.bf16.mxu0 (!%p1247_p5), %v1734_v35 }
 0x312   : > { %v964_v6 = vmax.f32 %v1349_v4, 0.0 }
 0x314   : > { %v973_v7 = vpack.c.bf16 %v964_v6, %v963_v5  ;;  %v1350_v8 = vpop.f32.mrb[20].mxu1 }
 0x315   : > { %v1351_v9 = vpop.f32.mrb[21].mxu1 }
 0x316   : > { %981 = vst [vmem:[#allocation2 + $0x30] sm:$0xff] %v973_v7  ;;  %v1352_v10 = vadd.f32 %v1351_v9, %v1350_v8  ;;  %v1353_v11 = vpop.f32.mrb[22].mxu1  ;;  %1464 = vmatprep.mubr.bf16.mxu1 (!%p1247_p5), %v973_v7 }
 0x317   : > { %v1354_v12 = vpop.f32.mrb[23].mxu1  ;;  %1457 = vmatmul.mubr.bf16.gmra.mrb[4].mxu0 (!%p1247_p5), %v1738_v44 }
 0x318   : > { %v1355_v13 = vadd.f32 %v1354_v12, %v1353_v11  ;;  %v965_v14 = vmax.f32 %v1352_v10, 0.0  ;;  %986 = sbr.rel (%p1247_p5) target bundleno = 1016 (0x3f8), region = 56 }
 0x31a   : > { %v966_v15 = vmax.f32 %v1355_v13, 0.0 }
 0x31c   : > { %v974_v16 = vpack.c.bf16 %v966_v15, %v965_v14 }
 0x31e   : > { %982 = vst [vmem:[#allocation2 + $0x38] sm:$0xff] %v974_v16  ;;  %1465 = vmatmul.mubr.bf16.gmra.mrb[4].mxu1 (!%p1247_p5), %v974_v16 }
 0x3e2   : > { %v1454_v26 = vpop.f32.mrb[0].mxu0  ;;  %v1462_v27 = vpop.f32.mrb[0].mxu1 }
 0x3e3   : > { %v1101_v28 = vadd.f32 %v1454_v26, %v1248_v25  ;;  %v1133_v29 = vadd.f32 %v1462_v27, %v1248_v25  ;;  %v1092_v30 = vpop.f32.mrb[1].mxu0  ;;  %v1124_v31 = vpop.f32.mrb[1].mxu1 }
 0x3e4   : > { %v1093_v32 = vadd.f32 %v1248_v25, %v1092_v30  ;;  %v1125_v33 = vadd.f32 %v1248_v25, %v1124_v31  ;;  %v1455_v34 = vpop.f32.mrb[2].mxu0  ;;  %v1463_v36 = vpop.f32.mrb[2].mxu1 }
 0x3e5   : > { %1157 = vst [vmem:[%s1835_s7 + $0x10] sm:$0xff] %v1101_v28  ;;  %1165 = vst [vmem:[%s1835_s7 + $0x50] sm:$0xff] %v1133_v29  ;;  %v1104_v35 = vadd.f32 %v1455_v34, %v1248_v25  ;;  %v1136_v37 = vadd.f32 %v1463_v36, %v1248_v25  ;;  %v1095_v38 = vpop.f32.mrb[3].mxu0  ;;  %v1127_v39 = vpop.f32.mrb[3].mxu1 }
 0x3e6   : > { %1155 = vst [vmem:[%s1835_s7] sm:$0xff] %v1093_v32  ;;  %1163 = vst [vmem:[%s1835_s7 + $0x40] sm:$0xff] %v1125_v33  ;;  %v1096_v40 = vadd.f32 %v1248_v25, %v1095_v38  ;;  %v1128_v41 = vadd.f32 %v1248_v25, %v1127_v39 }
 0x3e7   : > { %1158 = vst [vmem:[%s1835_s7 + $0x18] sm:$0xff] %v1104_v35  ;;  %1166 = vst [vmem:[%s1835_s7 + $0x58] sm:$0xff] %v1136_v37 }
 0x3e8   : > { %1156 = vst [vmem:[%s1835_s7 + $0x8] sm:$0xff] %v1096_v40  ;;  %1164 = vst [vmem:[%s1835_s7 + $0x48] sm:$0xff] %v1128_v41 }
 0x3ea   : > { %v1458_v42 = vpop.f32.mrb[4].mxu0 }
 0x3eb   : > { %v1117_v44 = vadd.f32 %v1458_v42, %v1248_v25  ;;  %v1108_v46 = vpop.f32.mrb[5].mxu0 }
 0x3ec   : > { %v1109_v48 = vadd.f32 %v1248_v25, %v1108_v46  ;;  %v1459_v50 = vpop.f32.mrb[6].mxu0 }
 0x3ed   : > { %1161 = vst [vmem:[%s1835_s7 + $0x30] sm:$0xff] %v1117_v44  ;;  %v1120_v52 = vadd.f32 %v1459_v50, %v1248_v25  ;;  %v1111_v54 = vpop.f32.mrb[7].mxu0 }
 0x3ee   : > { %1159 = vst [vmem:[%s1835_s7 + $0x20] sm:$0xff] %v1109_v48  ;;  %v1112_v56 = vadd.f32 %v1248_v25, %v1111_v54 }
 0x3ef   : > { %1162 = vst [vmem:[%s1835_s7 + $0x38] sm:$0xff] %v1120_v52 }
 0x3f0   : > { %1160 = vst [vmem:[%s1835_s7 + $0x28] sm:$0xff] %v1112_v56 }
 0x3f1   : > { %v1466_v43 = vpop.f32.mrb[4].mxu1 }
 0x3f2   : > { %v1149_v45 = vadd.f32 %v1466_v43, %v1248_v25  ;;  %v1140_v47 = vpop.f32.mrb[5].mxu1 }
 0x3f3   : > { %v1141_v49 = vadd.f32 %v1248_v25, %v1140_v47  ;;  %v1467_v51 = vpop.f32.mrb[6].mxu1 }
 0x3f4   : > { %1169 = vst [vmem:[%s1835_s7 + $0x70] sm:$0xff] %v1149_v45  ;;  %v1152_v53 = vadd.f32 %v1467_v51, %v1248_v25  ;;  %v1143_v55 = vpop.f32.mrb[7].mxu1 }
 0x3f5   : > { %1167 = vst [vmem:[%s1835_s7 + $0x60] sm:$0xff] %v1141_v49  ;;  %v1144_v57 = vadd.f32 %v1248_v25, %v1143_v55 }
 0x3f6   : > { %1170 = vst [vmem:[%s1835_s7 + $0x78] sm:$0xff] %v1152_v53 }
 0x3f7   : > { %1168 = vst [vmem:[%s1835_s7 + $0x68] sm:$0xff] %v1144_v57 }
 0x3f8 PF: > { %s17_s24 = sadd.s32 1, %s1578_s24  }
 0x3f9   : > { %p14_p6 = scmp.ge.s32.totalorder %s17_s24, 6  }
 0x3fb   :  { %16 = sbr.rel (!%p14_p6) target bundleno = 1 (0x1), region = 82 }

</bundles_post_ra>
